<compile_context>
chip_gen: v7x
topology: tpu7x:2x2x1
jax: 0.10.0
libtpu: 0.0.40
codegen_flags: <defaults>
</compile_context>

<pallas_src>
import functools

import jax
import jax.numpy as jnp
from jax.experimental import pallas as pl
from jax.experimental.pallas import tpu as pltpu


def _round_up(x: int, m: int) -> int:
    return ((x + m - 1) // m) * m


def _megacore_parts() -> int:
    """2 on chips where one Mosaic kernel drives two TensorCores (v4/v5p/v7x)."""
    try:
        kind = jax.devices()[0].device_kind.lower().replace(" ", "")
    except Exception:
        return 1
    if ("v4" in kind) or ("v5p" in kind) or ("7" in kind):
        return 2
    return 1


def _vmem_capacity_bytes() -> int:
    try:
        info = pltpu.get_tpu_info()
        return int(getattr(info, "vmem_capacity_bytes", 64 * 2**20))
    except Exception:
        return 64 * 2**20          # conservative (v7x per-core VMEM)


# --------------------------- Pass 1: Gram reduction ---------------------------
def _lrga_reduce_kernel(x_ref, w_ref, b_ref, g_ref, *,
                        n_valid: int, tile_n: int, tiles_per_part: int,
                        mxu_dtype):
    p = pl.program_id(0)   # megacore-parallel partition
    i = pl.program_id(1)   # reduction tile index within this partition

    @pl.when(i == 0)
    def _():
        g_ref[...] = jnp.zeros_like(g_ref)

    # X_aug = relu(x @ W_aug + b_aug); W_aug's ones-column bias is 1, so
    # X_aug[:, 4k] == 1 for every valid row; padded lane columns are 0.
    xb = x_ref[...].astype(mxu_dtype)
    X = jnp.dot(xb, w_ref[...], preferred_element_type=jnp.float32)
    X = jnp.maximum(X + b_ref[...], 0.0)

    def _accum(Xa):
        Xc = Xa.astype(mxu_dtype)
        # G += X_aug^T @ X_aug (holds V^T Z, colsum(U), colsum(V)) — one MXU
        # op per tile, f32 accumulation.
        g_ref[...] += jax.lax.dot_general(
            Xc, Xc, (((0,), (0,)), ((), ())),
            preferred_element_type=jnp.float32)

    if n_valid % tile_n == 0:
        _accum(X)                      # no ragged tail: no masking code at all
    else:
        row0 = (p * tiles_per_part + i) * tile_n
        is_full = row0 + tile_n <= n_valid

        @pl.when(is_full)
        def _():
            _accum(X)

        @pl.when(jnp.logical_not(is_full))
        def _():
            # Ragged last tile only: zero out-of-range rows (kills any garbage
            # from the partial block read) before accumulating.
            rows = jax.lax.broadcasted_iota(jnp.int32, (tile_n, 1), 0) + row0
            _accum(jnp.where(rows < n_valid, X, 0.0))


# ------------------------------- Pass 2: apply -------------------------------
def _lrga_apply_kernel(x_ref, w_ref, b_ref, m_ref, o_ref, *, mxu_dtype):
    xb = x_ref[...].astype(mxu_dtype)
    X = jnp.dot(xb, w_ref[...], preferred_element_type=jnp.float32)
    X = jnp.maximum(X + b_ref[...], 0.0)
    # out = X_aug @ M = [ D * U (V^T Z) , T ] — no concat, no k-wide slices.
    # Out-of-range rows of the last block are discarded by Pallas on writeback.
    o_ref[...] = jnp.dot(
        X.astype(m_ref.dtype), m_ref[...],
        preferred_element_type=jnp.float32).astype(o_ref.dtype)


# --------------------------------- Wrapper ---------------------------------
def lrga_forward(x, w, b, *, k: int, tile_n=None, mxu_dtype=jnp.bfloat16):
    """LRGA forward (eval mode).

    x: (N, d) node features
    w: (4k, d) torch nn.Linear weight layout
    b: (4k,)  bias
    mxu_dtype: matmul-input dtype (bf16 default; f32 for bit-faithful math).
    returns (N, 2k) float32
    """
    N, d = x.shape
    out_w = 2 * k
    A = _round_up(4 * k + 1, 128)       # lane-dense augmented width [U V Z T 1 | 0...]

    x = jnp.asarray(x)
    w = jnp.asarray(w, jnp.float32)
    b = jnp.asarray(b, jnp.float32)

    mxu_dtype = jnp.dtype(mxu_dtype)
    x_item = jnp.dtype(x.dtype).itemsize
    mxu_item = mxu_dtype.itemsize

    # Augmented weights/bias: zero-padded columns are inert through relu,
    # the Gram accumulation and M (their M rows are zero).
    w_aug = jnp.zeros((d, A), jnp.float32).at[:, :4 * k].set(w.T)
    b_aug = (jnp.zeros((1, A), jnp.float32)
             .at[0, :4 * k].set(b).at[0, 4 * k].set(1.0))
    w_mxu = w_aug.astype(mxu_dtype)

    # Row tile: auto-sized against a ~16 MiB working-set budget, multiple of
    # the sublane pack (16 for bf16, 8 for f32), clamped to the problem size.
    pack = 16 if mxu_item < 4 else 8
    per_row = (2 * d * x_item            # x tile, double buffered
               + A * (8 + mxu_item)      # X f32 intermediate (+slack) + cast
               + 2 * out_w * 4)          # output tile, double buffered
    if tile_n is None:
        tile_n = (16 * 2**20) // max(per_row, 1)
    tile_n = max(pack, min(int(tile_n), 8192, _round_up(N, pack)))
    tile_n = _round_up(tile_n, pack)

    nt = -(-N // tile_n)                 # number of row tiles
    # 2-way split of pass 1 only on megacore chips and only when it divides
    # evenly (so no fully out-of-bounds blocks are ever generated).
    n_parts = 2 if (_megacore_parts() >= 2 and nt >= 2 and nt % 2 == 0) else 1
    tiles_per_part = nt // n_parts

    est_bytes = (2 * tile_n * d * x_item
                 + tile_n * A * (8 + mxu_item)
                 + d * A * mxu_item + A * 4
                 + 2 * A * A * 4
                 + A * out_w * mxu_item
                 + 2 * tile_n * out_w * 4)
    vmem_cap = _vmem_capacity_bytes()
    vmem_limit = int(min(max(24 * 2**20, 2 * est_bytes),
                         (vmem_cap * 3) // 5, 40 * 2**20))

    # ---- Pass 1: G = sum over row tiles of X_aug^T X_aug ----
    g_parts = pl.pallas_call(
        functools.partial(_lrga_reduce_kernel, n_valid=N, tile_n=tile_n,
                          tiles_per_part=tiles_per_part, mxu_dtype=mxu_dtype),
        out_shape=jax.ShapeDtypeStruct((n_parts, A, A), jnp.float32),
        grid_spec=pltpu.PrefetchScalarGridSpec(
            num_scalar_prefetch=0,
            grid=(n_parts, tiles_per_part),
            in_specs=[
                pl.BlockSpec((tile_n, d),
                             lambda p, i, t=tiles_per_part: (p * t + i, 0)),
                pl.BlockSpec((d, A), lambda p, i: (0, 0)),
                pl.BlockSpec((1, A), lambda p, i: (0, 0)),
            ],
            out_specs=pl.BlockSpec((None, A, A), lambda p, i: (p, 0, 0)),
        ),
        compiler_params=pltpu.CompilerParams(
            dimension_semantics=("parallel", "arbitrary"),
            vmem_limit_bytes=vmem_limit),
        cost_estimate=pl.CostEstimate(
            flops=2 * nt * tile_n * d * A + 2 * nt * tile_n * A * A,
            transcendentals=0,
            bytes_accessed=(N * d * x_item + d * A * mxu_item + A * 4
                            + n_parts * A * A * 4)),
    )(x, w_mxu, b_aug)

    # ---- Tiny XLA glue: build the (A, 2k) output-projection matrix M ----
    g = g_parts[0] if n_parts == 1 else jnp.sum(g_parts, axis=0)   # (A, A)
    u_col = g[0:k, 4 * k]                              # colsum(U)
    v_col = g[k:2 * k, 4 * k]                          # colsum(V)
    vtz = g[k:2 * k, 2 * k:3 * k]                      # V^T Z
    norm = jnp.sum(u_col * v_col) / N + 1e-6
    d_scale = 1.0 / norm
    m = jnp.zeros((A, out_w), jnp.float32)
    m = m.at[0:k, 0:k].set(d_scale * vtz)              # U rows -> D * V^T Z
    m = m.at[3 * k:4 * k, k:2 * k].set(jnp.eye(k, dtype=jnp.float32))  # T rows
    m = m.astype(mxu_dtype)

    # ---- Pass 2: out = relu(x @ W_aug + b_aug) @ M ----
    out = pl.pallas_call(
        functools.partial(_lrga_apply_kernel, mxu_dtype=mxu_dtype),
        out_shape=jax.ShapeDtypeStruct((N, out_w), jnp.float32),
        grid_spec=pltpu.PrefetchScalarGridSpec(
            num_scalar_prefetch=0,
            grid=(nt,),
            in_specs=[
                pl.BlockSpec((tile_n, d), lambda i: (i, 0)),
                pl.BlockSpec((d, A), lambda i: (0, 0)),
                pl.BlockSpec((1, A), lambda i: (0, 0)),
                pl.BlockSpec((A, out_w), lambda i: (0, 0)),
            ],
            out_specs=pl.BlockSpec((tile_n, out_w), lambda i: (i, 0)),
        ),
        compiler_params=pltpu.CompilerParams(
            dimension_semantics=("parallel",),
            vmem_limit_bytes=vmem_limit),
        cost_estimate=pl.CostEstimate(
            flops=2 * nt * tile_n * d * A + 2 * nt * tile_n * A * out_w,
            transcendentals=0,
            bytes_accessed=(N * d * x_item + d * A * mxu_item + A * 4
                            + A * out_w * mxu_item + N * out_w * 4)),
    )(x, w_mxu, b_aug, m)

    return out


def lrga_reference(x, w, b, *, k: int):
    """Pure-JAX reference matching the PyTorch forward (eval mode)."""
    X = jax.nn.relu(x @ w.T + b)
    U, V, Z, T = X[:, :k], X[:, k:2 * k], X[:, 2 * k:3 * k], X[:, 3 * k:]
    norm = jnp.sum(U @ (V.T @ jnp.ones((x.shape[0], 1)))) / x.shape[0] + 1e-6
    res = U @ (V.T @ Z)
    return jnp.concatenate([res / norm, T], axis=1)


if __name__ == "__main__":
    # Small shapes consistent with the module (d input features, rank k).
    # N is deliberately NOT a multiple of the row tile to exercise masking.
    N, d, k = 200, 64, 8

    key = jax.random.PRNGKey(0)
    kx, kw, kb = jax.random.split(key, 3)

    x = jax.random.normal(kx, (N, d), dtype=jnp.float32)

    # Xavier-normal init for nn.Linear(d, 4k); small nonzero bias so the
    # ragged-tile masking in pass 1 is actually tested.
    fan_in, fan_out = d, 4 * k
    xavier_std = (2.0 / (fan_in + fan_out)) ** 0.5
    w = xavier_std * jax.random.normal(kw, (4 * k, d), dtype=jnp.float32)
    b = 0.1 * jax.random.normal(kb, (4 * k,), dtype=jnp.float32)

    ref = lrga_reference(x, w, b, k=k)

    # Exact-math check (f32 MXU path) with a small row tile to exercise the
    # grid loop, the ragged-tail mask branch and the Gram accumulator.
    out_f32 = jax.block_until_ready(
        lrga_forward(x, w, b, k=k, tile_n=64, mxu_dtype=jnp.float32))
    assert out_f32.shape == (N, 2 * k)
    assert jnp.allclose(out_f32, ref, atol=1e-3, rtol=1e-3), (
        float(jnp.max(jnp.abs(out_f32 - ref))))

    # Default fast path: bf16 MXU inputs (f32 accumulation), auto row tile.
    out = jax.block_until_ready(lrga_forward(x, w, b, k=k))
    assert out.shape == (N, 2 * k)
    assert jnp.allclose(out, ref, atol=5e-2, rtol=5e-2), (
        float(jnp.max(jnp.abs(out - ref))))

    print("KERNEL_OK")
</pallas_src>

<mosaic_0001>
module attributes {stable_mosaic.version = 11 : i64} {
  func.func @_lrga_reduce_kernel(%arg0: i32, %arg1: i32, %arg2: memref<64x64xf32, #tpu.memory_space<vmem>>, %arg3: memref<64x128xf32, #tpu.memory_space<vmem>>, %arg4: memref<1x128xf32, #tpu.memory_space<vmem>>, %arg5: memref<1x128x128xf32, #tpu.memory_space<vmem>>) attributes {dimension_semantics = [#tpu.dimension_semantics<parallel>, #tpu.dimension_semantics<arbitrary>], iteration_bounds = array<i64: 1, 4>, scalar_prefetch = 0 : i64, scratch_operands = 0 : i64, tpu.core_type = #tpu.core_type<tc>, window_params = [{transform_indices = @transform_0, window_bounds = array<i64: 64, 64>}, {pipeline_mode = #tpu.pipeline_mode<synchronous>, transform_indices = @transform_1, window_bounds = array<i64: 64, 128>}, {pipeline_mode = #tpu.pipeline_mode<synchronous>, transform_indices = @transform_2, window_bounds = array<i64: 1, 128>}, {transform_indices = @transform_3, window_bounds = array<i64: 1, 128, 128>}]} {
    %c0_i32 = arith.constant 0 : i32
    %0 = arith.cmpi eq, %arg1, %c0_i32 : i32
    %1 = arith.extui %0 : i1 to i32
    %c0_i32_0 = arith.constant 0 : i32
    %2 = arith.cmpi ne, %1, %c0_i32_0 : i32
    scf.if %2 {
      %cst_10 = arith.constant 0.000000e+00 : f32
      %21 = vector.broadcast %cst_10 : f32 to vector<128x128xf32>
      %c0_11 = arith.constant 0 : index
      %c0_12 = arith.constant 0 : index
      %c0_13 = arith.constant 0 : index
      %22 = vector.load %arg5[%c0_11, %c0_12, %c0_13] : memref<1x128x128xf32, #tpu.memory_space<vmem>>, vector<1x128x128xf32>
      %23 = vector.shape_cast %22 : vector<1x128x128xf32> to vector<128x128xf32>
      %24 = vector.shape_cast %21 : vector<128x128xf32> to vector<1x128x128xf32>
      tpu.vector_store %arg5[%c0_11, %c0_12, %c0_13], %24 {strides = array<i32>} : memref<1x128x128xf32, #tpu.memory_space<vmem>>, vector<1x128x128xf32>,
    } else {
    }
    %c0 = arith.constant 0 : index
    %c0_1 = arith.constant 0 : index
    %3 = vector.load %arg2[%c0, %c0_1] : memref<64x64xf32, #tpu.memory_space<vmem>>, vector<64x64xf32>
    %c0_2 = arith.constant 0 : index
    %c0_3 = arith.constant 0 : index
    %4 = vector.load %arg3[%c0_2, %c0_3] : memref<64x128xf32, #tpu.memory_space<vmem>>, vector<64x128xf32>
    %cst = arith.constant dense<0.000000e+00> : vector<64x128xf32>
    %5 = tpu.matmul %3, %4, %cst {dimension_numbers = #tpu.dot_dimension_numbers<[1], [0], [0], [1], [0, 0, 1, 1], [], []>} : vector<64x64xf32>, vector<64x128xf32>, vector<64x128xf32> -> vector<64x128xf32>
    %c0_4 = arith.constant 0 : index
    %c0_5 = arith.constant 0 : index
    %6 = vector.load %arg4[%c0_4, %c0_5] : memref<1x128xf32, #tpu.memory_space<vmem>>, vector<1x128xf32>
    %7 = vector.broadcast %6 : vector<1x128xf32> to vector<64x128xf32>
    %8 = arith.addf %5, %7 : vector<64x128xf32>
    %cst_6 = arith.constant 0.000000e+00 : f32
    %9 = vector.broadcast %cst_6 : f32 to vector<64x128xf32>
    %10 = arith.maximumf %8, %9 : vector<64x128xf32>
    %c4_i32 = arith.constant 4 : i32
    %11 = arith.muli %arg0, %c4_i32 : i32
    %12 = arith.addi %11, %arg1 : i32
    %c64_i32 = arith.constant 64 : i32
    %13 = arith.muli %12, %c64_i32 : i32
    %c64_i32_7 = arith.constant 64 : i32
    %14 = arith.addi %13, %c64_i32_7 : i32
    %c200_i32 = arith.constant 200 : i32
    %15 = arith.cmpi sle, %14, %c200_i32 : i32
    %16 = arith.extui %15 : i1 to i32
    %c0_i32_8 = arith.constant 0 : i32
    %17 = arith.cmpi ne, %16, %c0_i32_8 : i32
    scf.if %17 {
      %c0_10 = arith.constant 0 : index
      %c0_11 = arith.constant 0 : index
      %c0_12 = arith.constant 0 : index
      %21 = vector.load %arg5[%c0_10, %c0_11, %c0_12] : memref<1x128x128xf32, #tpu.memory_space<vmem>>, vector<1x128x128xf32>
      %22 = vector.shape_cast %21 : vector<1x128x128xf32> to vector<128x128xf32>
      %cst_13 = arith.constant dense<0.000000e+00> : vector<128x128xf32>
      %23 = tpu.matmul %10, %10, %cst_13 {dimension_numbers = #tpu.dot_dimension_numbers<[0], [0], [1], [1], [0, 1, 1, 1], [], []>} : vector<64x128xf32>, vector<64x128xf32>, vector<128x128xf32> -> vector<128x128xf32>
      %24 = arith.addf %22, %23 : vector<128x128xf32>
      %c0_14 = arith.constant 0 : index
      %c0_15 = arith.constant 0 : index
      %c0_16 = arith.constant 0 : index
      %25 = vector.load %arg5[%c0_14, %c0_15, %c0_16] : memref<1x128x128xf32, #tpu.memory_space<vmem>>, vector<1x128x128xf32>
      %26 = vector.shape_cast %25 : vector<1x128x128xf32> to vector<128x128xf32>
      %27 = vector.shape_cast %24 : vector<128x128xf32> to vector<1x128x128xf32>
      tpu.vector_store %arg5[%c0_14, %c0_15, %c0_16], %27 {strides = array<i32>} : memref<1x128x128xf32, #tpu.memory_space<vmem>>, vector<1x128x128xf32>,
    } else {
    }
    %true = arith.constant true
    %18 = arith.xori %15, %true : i1
    %19 = arith.extui %18 : i1 to i32
    %c0_i32_9 = arith.constant 0 : i32
    %20 = arith.cmpi ne, %19, %c0_i32_9 : i32
    scf.if %20 {
      %21 = tpu.iota {dimensions = array<i32: 0>} : vector<64x1xi32>
      %22 = vector.broadcast %13 : i32 to vector<64x1xi32>
      %23 = arith.addi %21, %22 : vector<64x1xi32>
      %c200_i32_10 = arith.constant 200 : i32
      %24 = vector.broadcast %c200_i32_10 : i32 to vector<64x1xi32>
      %25 = arith.cmpi slt, %23, %24 : vector<64x1xi32>
      %cst_11 = arith.constant 0.000000e+00 : f32
      %26 = vector.shape_cast %25 : vector<64x1xi1> to vector<64x1xi1>
      %27 = vector.broadcast %26 : vector<64x1xi1> to vector<64x128xi1>
      %28 = vector.broadcast %cst_11 : f32 to vector<64x128xf32>
      %29 = arith.select %27, %10, %28 : vector<64x128xi1>, vector<64x128xf32>
      %c0_12 = arith.constant 0 : index
      %c0_13 = arith.constant 0 : index
      %c0_14 = arith.constant 0 : index
      %30 = vector.load %arg5[%c0_12, %c0_13, %c0_14] : memref<1x128x128xf32, #tpu.memory_space<vmem>>, vector<1x128x128xf32>
      %31 = vector.shape_cast %30 : vector<1x128x128xf32> to vector<128x128xf32>
      %cst_15 = arith.constant dense<0.000000e+00> : vector<128x128xf32>
      %32 = tpu.matmul %29, %29, %cst_15 {dimension_numbers = #tpu.dot_dimension_numbers<[0], [0], [1], [1], [0, 1, 1, 1], [], []>} : vector<64x128xf32>, vector<64x128xf32>, vector<128x128xf32> -> vector<128x128xf32>
      %33 = arith.addf %31, %32 : vector<128x128xf32>
      %c0_16 = arith.constant 0 : index
      %c0_17 = arith.constant 0 : index
      %c0_18 = arith.constant 0 : index
      %34 = vector.load %arg5[%c0_16, %c0_17, %c0_18] : memref<1x128x128xf32, #tpu.memory_space<vmem>>, vector<1x128x128xf32>
      %35 = vector.shape_cast %34 : vector<1x128x128xf32> to vector<128x128xf32>
      %36 = vector.shape_cast %33 : vector<128x128xf32> to vector<1x128x128xf32>
      tpu.vector_store %arg5[%c0_16, %c0_17, %c0_18], %36 {strides = array<i32>} : memref<1x128x128xf32, #tpu.memory_space<vmem>>, vector<1x128x128xf32>,
    } else {
    }
    return
  }
  func.func @transform_0(%arg0: i32, %arg1: i32) -> (i32, i32) {
    %c4_i32 = arith.constant 4 : i32
    %0 = arith.muli %arg0, %c4_i32 : i32
    %1 = arith.addi %0, %arg1 : i32
    %c0_i32 = arith.constant 0 : i32
    %c0_i32_0 = arith.constant 0 : i32
    return %1, %c0_i32 : i32, i32
  }
  func.func @transform_1(%arg0: i32, %arg1: i32) -> (i32, i32) {
    %c0_i32 = arith.constant 0 : i32
    %c0_i32_0 = arith.constant 0 : i32
    %c0_i32_1 = arith.constant 0 : i32
    return %c0_i32, %c0_i32_0 : i32, i32
  }
  func.func @transform_2(%arg0: i32, %arg1: i32) -> (i32, i32) {
    %c0_i32 = arith.constant 0 : i32
    %c0_i32_0 = arith.constant 0 : i32
    %c0_i32_1 = arith.constant 0 : i32
    return %c0_i32, %c0_i32_0 : i32, i32
  }
  func.func @transform_3(%arg0: i32, %arg1: i32) -> (i32, i32, i32) {
    %c0_i32 = arith.constant 0 : i32
    %c0_i32_0 = arith.constant 0 : i32
    %c0_i32_1 = arith.constant 0 : i32
    return %arg0, %c0_i32, %c0_i32_0 : i32, i32, i32
  }
}

</mosaic_0001>

<bundles_post_ra>
// kernel: tpu_custom_call.1
= control target key start
LH: loop header
LB: loop body
LE: loop exit
PB: predicated region body
PF: predicated region fallthrough
CT: control target
= control target key end

     0   :  { %8 = vsyncpa [#allocation3], 0  ;;  %s1490_s12 = smov 0   ;;  %s1492_s13 = smov 0   ;;  %s1709_s0 = inlined_call_operand.vmem [shape: f32[200,64], index: 0, kind: input, shape index: {}]   ;;  %s1710_s1 = inlined_call_operand.vmem [shape: f32[64,128], index: 1, kind: input, shape index: {}]   ;;  %s1711_s2 = inlined_call_operand.vmem [shape: f32[1,128], index: 2, kind: input, shape index: {}]   ;;  %s1712_s3 = inlined_call_operand.hbm [shape: f32[1,128,128], index: 3, kind: output, shape index: {}]  }
   0x1   :  { %s1494_s14 = smov 0  }
   0x2 LB: > { %s1061_s15 = sadd.s32 4294967295, %s1464_s14   ;;  %s23_s16 = sadd.s32 1, %s1460_s13  ;;  %s1464_s14 = sphi %s1494_s14, %s14_s14   ;;  %s1460_s13 = sphi %s1492_s13, %s1717_s13   ;;  %s1456_s12 = sphi %s1490_s12, %s1716_s12  }
   0x3   : > { %p24_p0 = scmp.ge.s32.totalorder %s23_s16, 4  ;;  %p1064_p1 = scmp.ge.s32.totalorder %s1464_s14, 1 }
   0x4   : > { %p167_p2 = scmp.lt.s32.totalorder %s1464_s14, 5 }
   0x5   : > { %s1719_s16 = smov (%p24_p0, %s23_s16), 0 }
   0x6   : > { %p168_p3 = pnand %p1064_p1, %p167_p2 }
   0x7   : > { %s1065_s17 = sshll.u32 (!%p168_p3), %s1456_s12, 3  ;;  %p1067_p5 = scmp.ne.s32.totalorder (!%p168_p3), %s1456_s12, 0 }
   0x8   : > { %171 = sbr.rel (%p168_p3) target bundleno = 1106 (0x452), region = 32  ;;  %p199_p4 = scmp.lt.s32.totalorder (!%p168_p3), %s1065_s17, 24 }
   0xf   : > { %s1721_s17 = smov (!%p199_p4, %s1065_s17), 24  ;;  %213 = sbr.rel (%p1067_p5) target bundleno = 25 (0x19), region = 36 }
  0x10   : > { %s1066_s18 = sshll.u32 %s1721_s17, 3  ;;  %v1466_v0 = vmov (!%p1067_p5), 0.0  }
  0x11   : > { %s1515_s21 = scalar_lea.vmem %s1709_s0, %s1066_s18  ;;  %214 = vst [vmem:[#allocation2] sm:$0xff] (!%p1067_p5), %v1466_v0  ;;  %215 = vst [vmem:[#allocation2 + $0x8] sm:$0xff] (!%p1067_p5), %v1466_v0 }
  0x12   : > { %216 = vst [vmem:[#allocation2 + $0x10] sm:$0xff] (!%p1067_p5), %v1466_v0  ;;  %217 = vst [vmem:[#allocation2 + $0x18] sm:$0xff] (!%p1067_p5), %v1466_v0 }
  0x13   : > { %218 = vst [vmem:[#allocation2 + $0x20] sm:$0xff] (!%p1067_p5), %v1466_v0  ;;  %219 = vst [vmem:[#allocation2 + $0x28] sm:$0xff] (!%p1067_p5), %v1466_v0 }
  0x14   : > { %220 = vst [vmem:[#allocation2 + $0x30] sm:$0xff] (!%p1067_p5), %v1466_v0  ;;  %221 = vst [vmem:[#allocation2 + $0x38] sm:$0xff] (!%p1067_p5), %v1466_v0 }
  0x15   : > { %222 = vst [vmem:[#allocation2 + $0x40] sm:$0xff] (!%p1067_p5), %v1466_v0  ;;  %223 = vst [vmem:[#allocation2 + $0x48] sm:$0xff] (!%p1067_p5), %v1466_v0 }
  0x16   : > { %224 = vst [vmem:[#allocation2 + $0x50] sm:$0xff] %v1466_v0  ;;  %225 = vst [vmem:[#allocation2 + $0x58] sm:$0xff] %v1466_v0 }
  0x17   : > { %226 = vst [vmem:[#allocation2 + $0x60] sm:$0xff] %v1466_v0  ;;  %227 = vst [vmem:[#allocation2 + $0x68] sm:$0xff] %v1466_v0 }
  0x18   : > { %228 = vst [vmem:[#allocation2 + $0x70] sm:$0xff] %v1466_v0  ;;  %229 = vst [vmem:[#allocation2 + $0x78] sm:$0xff] %v1466_v0 }
  0x19 PF: > { %v238_v1 = vld [vmem:[%s1710_s1] sm:$0xff]  ;;  %v239_v2 = vld [vmem:[%s1710_s1 + $0x8] sm:$0xff]  ;;  %v240_v3 = vld [vmem:[%s1710_s1 + $0x10] sm:$0xff]  ;;  %vm253_vm0 = vcmask 523264   ;;  %s1077_s11 = sshll.u32 %s1456_s12, 6 }
  0x1a   : > { %v1296_v4 = vpack.c.bf16 %v239_v2, %v238_v1  ;;  %v241_v5 = vld [vmem:[%s1710_s1 + $0x18] sm:$0xff]  ;;  %v242_v7 = vld [vmem:[%s1710_s1 + $0x20] sm:$0xff]  ;;  %v243_v8 = vld [vmem:[%s1710_s1 + $0x28] sm:$0xff]  ;;  %s1561_s17 = sadd.s32 64, %s1077_s11 }
  0x1b   : > { %v1300_v6 = vpack.c.bf16 %v241_v5, %v240_v3  ;;  %v230_v9 = vld [vmem:[%s1515_s21] sm:$0xff]  ;;  %v1304_v11 = vpack.c.bf16 %v243_v8, %v242_v7  ;;  %v244_v12 = vld [vmem:[%s1710_s1 + $0x30] sm:$0xff]  ;;  %v245_v13 = vld [vmem:[%s1710_s1 + $0x38] sm:$0xff]  ;;  %p1078_p6 = scmp.gt.s32.totalorder %s1561_s17, 200 }
  0x1c   : > { %1297 = vmatprep.subr.bf16.mxu0 %v1296_v4  ;;  %1352 = vmatprep.subr.bf16.mxu1 %v1296_v4  ;;  %v234_v10 = vld [vmem:[%s1515_s21 + $0x20] sm:$0xff]  ;;  %v1308_v14 = vpack.c.bf16 %v245_v13, %v244_v12  ;;  %v231_v15 = vld [vmem:[%s1515_s21 + $0x8] sm:$0xff]  ;;  %v232_v17 = vld [vmem:[%s1515_s21 + $0x10] sm:$0xff] }
  0x1d   : > { %1299 = vmatpush3.bf16.msra.mxu0 %v1296_v4  ;;  %1356 = vmatpush3.bf16.msra.mxu1 %v1296_v4  ;;  %v235_v16 = vld [vmem:[%s1515_s21 + $0x28] sm:$0xff]  ;;  %v236_v18 = vld [vmem:[%s1515_s21 + $0x30] sm:$0xff]  ;;  %v233_v19 = vld [vmem:[%s1515_s21 + $0x18] sm:$0xff] }
  0x1e   : > { %1301 = vmatprep.subr.bf16.mxu0 %v1300_v6  ;;  %1353 = vmatprep.subr.bf16.mxu1 %v1300_v6  ;;  %v237_v20 = vld [vmem:[%s1515_s21 + $0x38] sm:$0xff]  ;;  %v1068_v21 = vld [vmem:[%s1711_s2] ss:$0 sm:$0xff]  ;;  %v400_v2 = vld [vmem:[#allocation2 + $0x8] sm:$0xff] (!%p1078_p6) }
  0x1f   : > { %1204 = vmatprep.mubr.msk.f32.mxu0 %vm253_vm0, %v230_v9  ;;  %1210 = vmatprep.mubr.msk.f32.mxu1 %vm253_vm0, %v234_v10  ;;  %v399_v3 = vld [vmem:[#allocation2] sm:$0xff] (!%p1078_p6)  ;;  %v402_v8 = vld [vmem:[#allocation2 + $0x18] sm:$0xff] (!%p1078_p6)  ;;  %v401_v9 = vld [vmem:[#allocation2 + $0x10] sm:$0xff] (!%p1078_p6) }
  0x21   : > { %1303 = vmatpush3.bf16.msra.mxu0 %v1300_v6  ;;  %1357 = vmatpush3.bf16.msra.mxu1 %v1300_v6 }
  0x22   : > { %1305 = vmatprep.subr.bf16.mxu0 %v1304_v11  ;;  %1354 = vmatprep.subr.bf16.mxu1 %v1304_v11 }
  0x25   : > { %1307 = vmatpush3.bf16.msra.mxu0 %v1304_v11  ;;  %1358 = vmatpush3.bf16.msra.mxu1 %v1304_v11 }
  0x26   : > { %1309 = vmatprep.subr.bf16.mxu0 %v1308_v14  ;;  %1355 = vmatprep.subr.bf16.mxu1 %v1308_v14 }
  0x29   : > { %1311 = vmatpush3.bf16.msra.mxu0 %v1308_v14  ;;  %1359 = vmatpush3.bf16.msra.mxu1 %v1308_v14  ;;  %v404_v14 = vld [vmem:[#allocation2 + $0x28] sm:$0xff] (!%p1078_p6) }
  0x2c   : > { %1205 = vmatmul.mubr.msk.f32.vlgmr.msra.gmra.mrb[0].mxu0 %vm253_vm0, %v231_v15  ;;  %1211 = vmatmul.mubr.msk.f32.vlgmr.msra.gmra.mrb[0].mxu1 %vm253_vm0, %v235_v16  ;;  %v403_v15 = vld [vmem:[#allocation2 + $0x20] sm:$0xff] (!%p1078_p6) }
  0x2d   : > { %1207 = vmatprep.mubr.msk.f32.mxu0 %vm253_vm0, %v232_v17  ;;  %1213 = vmatprep.mubr.msk.f32.mxu1 %vm253_vm0, %v236_v18 }
  0x30   : > { %1208 = vmatmul.mubr.msk.f32.gmra.mrb[2].mxu0 %vm253_vm0, %v233_v19  ;;  %1214 = vmatmul.mubr.msk.f32.gmra.mrb[2].mxu1 %vm253_vm0, %v237_v20  ;;  %v406_v20 = vld [vmem:[#allocation2 + $0x38] sm:$0xff] (!%p1078_p6) }
  0xff   : > { %v1206_v22 = vpop.f32.mrb[0].mxu0  ;;  %v1212_v23 = vpop.f32.mrb[0].mxu1 }
 0x100   : > { %v350_v24 = vadd.f32 %v1206_v22, %v1068_v21  ;;  %v370_v25 = vadd.f32 %v1212_v23, %v1068_v21  ;;  %v344_v26 = vpop.f32.mrb[1].mxu0  ;;  %v364_v27 = vpop.f32.mrb[1].mxu1 }
 0x101   : > { %v345_v28 = vadd.f32 %v1068_v21, %v344_v26  ;;  %v365_v29 = vadd.f32 %v1068_v21, %v364_v27  ;;  %398 = sbr.rel (%p1078_p6) target bundleno = 666 (0x29a), region = 40  ;;  %v408_v26 = vld [vmem:[#allocation2 + $0x48] sm:$0xff] (!%p1078_p6)  ;;  %v407_v27 = vld [vmem:[#allocation2 + $0x40] sm:$0xff] (!%p1078_p6) }
 0x102   : > { %v1566_v30 = vmax.f32 %v350_v24, 0.0  ;;  %v1568_v31 = vmax.f32 %v370_v25, 0.0 }
 0x103   : > { %v1570_v32 = vmax.f32 %v345_v28, 0.0  ;;  %v1572_v33 = vmax.f32 %v365_v29, 0.0  ;;  %v1209_v34 = vpop.f32.mrb[2].mxu0  ;;  %v1215_v35 = vpop.f32.mrb[2].mxu1 }
 0x104   : > { %v360_v36 = vadd.f32 %v1209_v34, %v1068_v21  ;;  %v380_v37 = vadd.f32 %v1215_v35, %v1068_v21  ;;  %v354_v38 = vpop.f32.mrb[3].mxu0  ;;  %v374_v39 = vpop.f32.mrb[3].mxu1 }
 0x105   : > { %v355_v40 = vadd.f32 %v1068_v21, %v354_v38  ;;  %v375_v41 = vadd.f32 %v1068_v21, %v374_v39  ;;  %415 = vxpose.xlu0.b32.start [1/8] (short) (!%p1078_p6), %v1570_v32, 128  ;;  %v1312_v46 = vpack.c.bf16 (!%p1078_p6), %v1566_v30, %v1570_v32  ;;  %v1320_v48 = vpack.c.bf16 (!%p1078_p6), %v1568_v31, %v1572_v33  ;;  %v405_v21 = vld [vmem:[#allocation2 + $0x30] sm:$0xff] (!%p1078_p6) }
 0x106   : > { %v1574_v42 = vmax.f32 %v360_v36, 0.0  ;;  %v1576_v43 = vmax.f32 %v380_v37, 0.0  ;;  %v410_v36 = vld [vmem:[#allocation2 + $0x58] sm:$0xff] (!%p1078_p6)  ;;  %v409_v37 = vld [vmem:[#allocation2 + $0x50] sm:$0xff] (!%p1078_p6) }
 0x107   : > { %v1578_v44 = vmax.f32 %v355_v40, 0.0  ;;  %v1580_v45 = vmax.f32 %v375_v41, 0.0  ;;  %1313 = vmatprep.subr.bf16.mxu0 (!%p1078_p6), %v1312_v46  ;;  %1360 = vmatprep.subr.bf16.mxu1 (!%p1078_p6), %v1312_v46 }
 0x108   : > { %1315 = vmatpush3.bf16.msra.mxu0 %v1312_v46  ;;  %1364 = vmatpush3.bf16.msra.mxu1 %v1312_v46  ;;  %v412_v46 = vld [vmem:[#allocation2 + $0x68] sm:$0xff] }
 0x109   : > { %v1316_v47 = vpack.c.bf16 %v1574_v42, %v1578_v44  ;;  %416 = vxpose.xlu0.b32.cont [2/8] (short) %v1566_v30, 128  ;;  %v1324_v49 = vpack.c.bf16 %v1576_v43, %v1580_v45 }
 0x10b   : > { %1317 = vmatprep.subr.bf16.mxu0 %v1316_v47  ;;  %1361 = vmatprep.subr.bf16.mxu1 %v1316_v47 }
 0x10c   : > { %1319 = vmatpush3.bf16.msra.mxu0 %v1316_v47  ;;  %1365 = vmatpush3.bf16.msra.mxu1 %v1316_v47  ;;  %v411_v47 = vld [vmem:[#allocation2 + $0x60] sm:$0xff] }
 0x10d   : > { %417 = vxpose.xlu0.b32.cont [3/8] (short) %v1578_v44, 128  ;;  %1321 = vmatprep.subr.bf16.mxu0 %v1320_v48 }
 0x10e   : > { %1362 = vmatprep.subr.bf16.mxu1 %v1320_v48 }
 0x110   : > { %1323 = vmatpush3.bf16.msra.mxu0 %v1320_v48  ;;  %1366 = vmatpush3.bf16.msra.mxu1 %v1320_v48 }
 0x111   : > { %418 = vxpose.xlu0.b32.cont [4/8] (short) %v1574_v42, 128  ;;  %1325 = vmatprep.subr.bf16.mxu0 %v1324_v49 }
 0x112   : > { %1363 = vmatprep.subr.bf16.mxu1 %v1324_v49 }
 0x114   : > { %1327 = vmatpush3.bf16.msra.mxu0 %v1324_v49  ;;  %1367 = vmatpush3.bf16.msra.mxu1 %v1324_v49 }
 0x115   : > { %419 = vxpose.xlu0.b32.cont [5/8] (short) %v1572_v33, 128 }
 0x119   : > { %420 = vxpose.xlu0.b32.cont [6/8] (short) %v1568_v31, 128 }
 0x11d   : > { %421 = vxpose.xlu0.b32.cont [7/8] (short) %v1580_v45, 128 }
 0x121   : > { %422 = vxpose.xlu0.b32.end [8/8] (short) %v1576_v43, 128 }
 0x185   : > { %v431_v50 = vpop.trf.xlu0 }
 0x186   : > { %1232 = vmatprep.mubr.msk.f32.mxu0 %vm253_vm0, %v431_v50 }
 0x189   : > { %v432_v51 = vpop.trf.xlu0 }
 0x18a   : > { %1233 = vmatmul.mubr.msk.f32.vlgmr.msra.gmra.mrb[0].mxu0 %vm253_vm0, %v432_v51 }
 0x18d   : > { %v433_v52 = vpop.trf.xlu0 }
 0x18e   : > { %1235 = vmatprep.mubr.msk.f32.mxu0 %vm253_vm0, %v433_v52  ;;  %v414_v52 = vld [vmem:[#allocation2 + $0x78] sm:$0xff] }
 0x191   : > { %v434_v53 = vpop.trf.xlu0 }
 0x192   : > { %1236 = vmatmul.mubr.msk.f32.gmra.mrb[2].mxu0 %vm253_vm0, %v434_v53  ;;  %v413_v53 = vld [vmem:[#allocation2 + $0x70] sm:$0xff] }
 0x195   : > { %v435_v54 = vpop.trf.xlu0 }
 0x196   : > { %1238 = vmatprep.mubr.msk.f32.mxu0 %vm253_vm0, %v435_v54 }
 0x199   : > { %v436_v55 = vpop.trf.xlu0 }
 0x19a   : > { %1239 = vmatmul.mubr.msk.f32.gmra.mrb[4].mxu0 %vm253_vm0, %v436_v55 }
 0x19d   : > { %v437_v56 = vpop.trf.xlu0 }
 0x19e   : > { %1241 = vmatprep.mubr.msk.f32.mxu0 %vm253_vm0, %v437_v56 }
 0x1a1   : > { %v438_v57 = vpop.trf.xlu0 }
 0x1a2   : > { %1242 = vmatmul.mubr.msk.f32.gmra.mrb[6].mxu0 %vm253_vm0, %v438_v57 }
 0x1a5   : > { %v439_v58 = vpop.trf.xlu0 }
 0x1a6   : > { %1244 = vmatprep.mubr.msk.f32.mxu1 %vm253_vm0, %v439_v58 }
 0x1a9   : > { %v440_v59 = vpop.trf.xlu0 }
 0x1aa   : > { %1245 = vmatmul.mubr.msk.f32.vlgmr.msra.gmra.mrb[0].mxu1 %vm253_vm0, %v440_v59 }
 0x1ad   : > { %v441_v60 = vpop.trf.xlu0 }
 0x1ae   : > { %1247 = vmatprep.mubr.msk.f32.mxu1 %vm253_vm0, %v441_v60 }
 0x1b1   : > { %v442_v61 = vpop.trf.xlu0 }
 0x1b2   : > { %1248 = vmatmul.mubr.msk.f32.gmra.mrb[2].mxu1 %vm253_vm0, %v442_v61 }
 0x1b5   : > { %v443_v62 = vpop.trf.xlu0 }
 0x1b6   : > { %1250 = vmatprep.mubr.msk.f32.mxu1 %vm253_vm0, %v443_v62 }
 0x1b9   : > { %v444_v63 = vpop.trf.xlu0 }
 0x1ba   : > { %1251 = vmatmul.mubr.msk.f32.gmra.mrb[4].mxu1 %vm253_vm0, %v444_v63 }
 0x1bd   : > { %v445_v0 = vpop.trf.xlu0 }
 0x1be   : > { %1253 = vmatprep.mubr.msk.f32.mxu1 %vm253_vm0, %v445_v0 }
 0x1c1   : > { %v446_v1 = vpop.trf.xlu0 }
 0x1c2   : > { %1254 = vmatmul.mubr.msk.f32.gmra.mrb[6].mxu1 %vm253_vm0, %v446_v1 }
 0x25d   : > { %v1234_v4 = vpop.f32.mrb[0].mxu0 }
 0x25e   : > { %v641_v5 = vadd.f32 %v1234_v4, %v400_v2  ;;  %v561_v6 = vpop.f32.mrb[1].mxu0 }
 0x25f   : > { %v640_v7 = vadd.f32 %v561_v6, %v399_v3 }
 0x260   : > { %657 = vst [vmem:[#allocation2 + $0x8] sm:$0xff] %v641_v5 }
 0x261   : > { %656 = vst [vmem:[#allocation2] sm:$0xff] %v640_v7 }
 0x265   : > { %v1237_v10 = vpop.f32.mrb[2].mxu0 }
 0x266   : > { %v643_v11 = vadd.f32 %v1237_v10, %v402_v8  ;;  %v571_v12 = vpop.f32.mrb[3].mxu0 }
 0x267   : > { %v642_v13 = vadd.f32 %v571_v12, %v401_v9 }
 0x268   : > { %659 = vst [vmem:[#allocation2 + $0x18] sm:$0xff] %v643_v11 }
 0x269   : > { %658 = vst [vmem:[#allocation2 + $0x10] sm:$0xff] %v642_v13 }
 0x26d   : > { %v1240_v16 = vpop.f32.mrb[4].mxu0 }
 0x26e   : > { %v645_v17 = vadd.f32 %v1240_v16, %v404_v14  ;;  %v581_v18 = vpop.f32.mrb[5].mxu0 }
 0x26f   : > { %v644_v19 = vadd.f32 %v581_v18, %v403_v15 }
 0x270   : > { %661 = vst [vmem:[#allocation2 + $0x28] sm:$0xff] %v645_v17 }
 0x271   : > { %660 = vst [vmem:[#allocation2 + $0x20] sm:$0xff] %v644_v19 }
 0x275   : > { %v1243_v22 = vpop.f32.mrb[6].mxu0 }
 0x276   : > { %v647_v23 = vadd.f32 %v1243_v22, %v406_v20  ;;  %v591_v24 = vpop.f32.mrb[7].mxu0 }
 0x277   : > { %v646_v25 = vadd.f32 %v591_v24, %v405_v21 }
 0x278   : > { %663 = vst [vmem:[#allocation2 + $0x38] sm:$0xff] %v647_v23 }
 0x279   : > { %662 = vst [vmem:[#allocation2 + $0x30] sm:$0xff] %v646_v25 }
 0x27d   : > { %v1246_v28 = vpop.f32.mrb[0].mxu1 }
 0x27e   : > { %v649_v29 = vadd.f32 %v1246_v28, %v408_v26  ;;  %v601_v34 = vpop.f32.mrb[1].mxu1 }
 0x27f   : > { %v648_v35 = vadd.f32 %v601_v34, %v407_v27 }
 0x280   : > { %665 = vst [vmem:[#allocation2 + $0x48] sm:$0xff] %v649_v29 }
 0x281   : > { %664 = vst [vmem:[#allocation2 + $0x40] sm:$0xff] %v648_v35 }
 0x285   : > { %v1249_v38 = vpop.f32.mrb[2].mxu1 }
 0x286   : > { %v651_v39 = vadd.f32 %v1249_v38, %v410_v36  ;;  %v611_v40 = vpop.f32.mrb[3].mxu1 }
 0x287   : > { %v650_v41 = vadd.f32 %v611_v40, %v409_v37 }
 0x288   : > { %667 = vst [vmem:[#allocation2 + $0x58] sm:$0xff] %v651_v39 }
 0x289   : > { %666 = vst [vmem:[#allocation2 + $0x50] sm:$0xff] %v650_v41 }
 0x28d   : > { %v1252_v48 = vpop.f32.mrb[4].mxu1 }
 0x28e   : > { %v653_v49 = vadd.f32 %v1252_v48, %v412_v46  ;;  %v621_v50 = vpop.f32.mrb[5].mxu1 }
 0x28f   : > { %v652_v51 = vadd.f32 %v621_v50, %v411_v47 }
 0x290   : > { %669 = vst [vmem:[#allocation2 + $0x68] sm:$0xff] %v653_v49 }
 0x291   : > { %668 = vst [vmem:[#allocation2 + $0x60] sm:$0xff] %v652_v51 }
 0x295   : > { %v1255_v54 = vpop.f32.mrb[6].mxu1 }
 0x296   : > { %v655_v55 = vadd.f32 %v1255_v54, %v414_v52  ;;  %v631_v56 = vpop.f32.mrb[7].mxu1 }
 0x297   : > { %v654_v57 = vadd.f32 %v631_v56, %v413_v53 }
 0x298   : > { %671 = vst [vmem:[#allocation2 + $0x78] sm:$0xff] %v655_v55 }
 0x299   : > { %670 = vst [vmem:[#allocation2 + $0x70] sm:$0xff] %v654_v57 }
 0x29a PF: > { %p1095_p7 = scmp.le.s32.totalorder %s1561_s17, 200 }
 0x29b   : > { %v676_v58 = vlaneseq (!%p1095_p7)  ;;  %v685_v59 = vstv (!%p1095_p7), %s1077_s11  ;;  %v1328_v3 = vpack.c.bf16 (!%p1095_p7), %v1566_v30, %v1570_v32  ;;  %v1334_v9 = vpack.c.bf16 (!%p1095_p7), %v1574_v42, %v1578_v44  ;;  %v727_v37 = vld [vmem:[#allocation2 + $0x8] sm:$0xff] (!%p1095_p7)  ;;  %v726_v38 = vld [vmem:[#allocation2] sm:$0xff] (!%p1095_p7)  ;;  %v729_v47 = vld [vmem:[#allocation2 + $0x18] sm:$0xff] (!%p1095_p7) }
 0x29c   : > { %675 = sbr.rel (%p1095_p7) target bundleno = 1080 (0x438), region = 44  ;;  %v1346_v17 = vpack.c.bf16 (!%p1095_p7), %v1576_v43, %v1580_v45  ;;  %v728_v48 = vld [vmem:[#allocation2 + $0x10] sm:$0xff] (!%p1095_p7)  ;;  %v731_v53 = vld [vmem:[#allocation2 + $0x28] sm:$0xff] (!%p1095_p7)  ;;  %v730_v54 = vld [vmem:[#allocation2 + $0x20] sm:$0xff] (!%p1095_p7) }
 0x29d   : > { %v677_v60 = vshrl.u32 (!%p1095_p7), %v676_v58, 7  ;;  %v738_v14 = vld [vmem:[#allocation2 + $0x60] sm:$0xff] (!%p1095_p7) }
 0x29f   : > { %v686_v61 = vadd.s32 (!%p1095_p7), %v685_v59, %v677_v60  ;;  %v678_v62 = vadd.s32 (!%p1095_p7), 8, %v677_v60  ;;  %v679_v63 = vadd.s32 (!%p1095_p7), 16, %v677_v60  ;;  %v680_v0 = vadd.s32 (!%p1095_p7), 24, %v677_v60 }
 0x2a0   : > { %v681_v1 = vadd.s32 (!%p1095_p7), 32, %v677_v60  ;;  %v682_v2 = vadd.s32 (!%p1095_p7), 40, %v677_v60  ;;  %v683_v8 = vadd.s32 (!%p1095_p7), 48, %v677_v60  ;;  %v684_v12 = vadd.s32 (!%p1095_p7), 56, %v677_v60  ;;  %v732_v60 = vld [vmem:[#allocation2 + $0x30] sm:$0xff] (!%p1095_p7) }
 0x2a1   : > { %vm694_vm1 = vcmp.lt.s32.totalorder (!%p1095_p7), %v686_v61, 200  ;;  %v687_v4 = vadd.s32 (!%p1095_p7), %v685_v59, %v678_v62  ;;  %v688_v5 = vadd.s32 (!%p1095_p7), %v685_v59, %v679_v63  ;;  %v689_v6 = vadd.s32 (!%p1095_p7), %v685_v59, %v680_v0 }
 0x2a2   : > { %v718_v7 = vsel (!%p1095_p7), %vm694_vm1, %v1570_v32, 0.0  ;;  %v690_v10 = vadd.s32 (!%p1095_p7), %v685_v59, %v681_v1  ;;  %v691_v11 = vadd.s32 (!%p1095_p7), %v685_v59, %v682_v2  ;;  %v1340_v32 = vpack.c.bf16 (!%p1095_p7), %v1568_v31, %v1572_v33  ;;  %v735_v1 = vld [vmem:[#allocation2 + $0x48] sm:$0xff] (!%p1095_p7)  ;;  %v734_v2 = vld [vmem:[#allocation2 + $0x40] sm:$0xff] (!%p1095_p7) }
 0x2a3   : > { %742 = vxpose.xlu0.b32.start [1/8] (short) %v718_v7, 128  ;;  %vm695_vm2 = vcmp.lt.s32.totalorder %v687_v4, 200  ;;  %vm696_vm4 = vcmp.lt.s32.totalorder %v688_v5, 200  ;;  %vm697_vm5 = vcmp.lt.s32.totalorder %v689_v6, 200  ;;  %v692_v15 = vadd.s32 %v685_v59, %v683_v8  ;;  %v737_v7 = vld [vmem:[#allocation2 + $0x58] sm:$0xff]  ;;  %v736_v8 = vld [vmem:[#allocation2 + $0x50] sm:$0xff] }
 0x2a4   : > { %v719_v13 = vsel %vm695_vm2, %v1566_v30, 0.0  ;;  %vm1329_vm3 = vmpackc.low %vm695_vm2, %vm694_vm1  ;;  %vm698_vm7 = vcmp.lt.s32.totalorder %v690_v10, 200  ;;  %vm699_vm8 = vcmp.lt.s32.totalorder %v691_v11, 200  ;;  %v693_v30 = vadd.s32 %v685_v59, %v684_v12  ;;  %v733_v59 = vld [vmem:[#allocation2 + $0x38] sm:$0xff] }
 0x2a5   : > { %vm1625_vm6 = vmpackc.low %vm697_vm5, %vm696_vm4  ;;  %1330 = vmatprep.subr.msk.bf16.mxu0 %vm1329_vm3, %v1328_v3  ;;  %1368 = vmatprep.subr.msk.bf16.mxu1 %vm1329_vm3, %v1328_v3  ;;  %v720_v16 = vsel %vm696_vm4, %v1578_v44, 0.0  ;;  %vm700_vm10 = vcmp.lt.s32.totalorder %v692_v15, 200  ;;  %v721_v44 = vsel %vm697_vm5, %v1574_v42, 0.0  ;;  %v722_v18 = vsel %vm698_vm7, %v1572_v33, 0.0 }
 0x2a6   : > { %1333 = vmatpush3.bf16.msk.msra.mxu0 %vm1329_vm3, %v1328_v3  ;;  %1372 = vmatpush3.bf16.msk.msra.mxu1 %vm1329_vm3, %v1328_v3  ;;  %vm1341_vm9 = vmpackc.low %vm699_vm8, %vm698_vm7  ;;  %vm701_vm11 = vcmp.lt.s32.totalorder %v693_v30, 200  ;;  %v723_v19 = vsel %vm699_vm8, %v1568_v31, 0.0  ;;  %v724_v42 = vsel %vm700_vm10, %v1580_v45, 0.0 }
 0x2a7   : > { %743 = vxpose.xlu0.b32.cont [2/8] (short) %v719_v13, 128  ;;  %1336 = vmatprep.subr.msk.bf16.mxu0 %vm1625_vm6, %v1334_v9  ;;  %vm1347_vm12 = vmpackc.low %vm701_vm11, %vm700_vm10  ;;  %v725_v20 = vsel %vm701_vm11, %v1576_v43, 0.0  ;;  %v739_v13 = vld [vmem:[#allocation2 + $0x68] sm:$0xff] }
 0x2a8   : > { %1369 = vmatprep.subr.msk.bf16.mxu1 %vm1625_vm6, %v1334_v9 }
 0x2aa   : > { %1339 = vmatpush3.bf16.msk.msra.mxu0 %vm1625_vm6, %v1334_v9  ;;  %1373 = vmatpush3.bf16.msk.msra.mxu1 %vm1625_vm6, %v1334_v9 }
 0x2ab   : > { %744 = vxpose.xlu0.b32.cont [3/8] (short) %v720_v16, 128  ;;  %1342 = vmatprep.subr.msk.bf16.mxu0 %vm1341_vm9, %v1340_v32 }
 0x2ac   : > { %1370 = vmatprep.subr.msk.bf16.mxu1 %vm1341_vm9, %v1340_v32 }
 0x2ae   : > { %1345 = vmatpush3.bf16.msk.msra.mxu0 %vm1341_vm9, %v1340_v32  ;;  %1374 = vmatpush3.bf16.msk.msra.mxu1 %vm1341_vm9, %v1340_v32 }
 0x2af   : > { %745 = vxpose.xlu0.b32.cont [4/8] (short) %v721_v44, 128  ;;  %1348 = vmatprep.subr.msk.bf16.mxu0 %vm1347_vm12, %v1346_v17  ;;  %v740_v44 = vld [vmem:[#allocation2 + $0x70] sm:$0xff] }
 0x2b0   : > { %1371 = vmatprep.subr.msk.bf16.mxu1 %vm1347_vm12, %v1346_v17 }
 0x2b2   : > { %1351 = vmatpush3.bf16.msk.msra.mxu0 %vm1347_vm12, %v1346_v17  ;;  %1375 = vmatpush3.bf16.msk.msra.mxu1 %vm1347_vm12, %v1346_v17  ;;  %v741_v17 = vld [vmem:[#allocation2 + $0x78] sm:$0xff] }
 0x2b3   : > { %746 = vxpose.xlu0.b32.cont [5/8] (short) %v722_v18, 128 }
 0x2b7   : > { %747 = vxpose.xlu0.b32.cont [6/8] (short) %v723_v19, 128 }
 0x2bb   : > { %748 = vxpose.xlu0.b32.cont [7/8] (short) %v724_v42, 128 }
 0x2bf   : > { %749 = vxpose.xlu0.b32.end [8/8] (short) %v725_v20, 128 }
 0x323   : > { %v758_v21 = vpop.trf.xlu0 }
 0x324   : > { %1272 = vmatprep.mubr.msk.f32.mxu0 %vm253_vm0, %v758_v21 }
 0x327   : > { %v759_v33 = vpop.trf.xlu0 }
 0x328   : > { %1273 = vmatmul.mubr.msk.f32.vlgmr.msra.gmra.mrb[0].mxu0 %vm253_vm0, %v759_v33 }
 0x32b   : > { %v760_v22 = vpop.trf.xlu0 }
 0x32c   : > { %1275 = vmatprep.mubr.msk.f32.mxu0 %vm253_vm0, %v760_v22 }
 0x32f   : > { %v761_v23 = vpop.trf.xlu0 }
 0x330   : > { %1276 = vmatmul.mubr.msk.f32.gmra.mrb[2].mxu0 %vm253_vm0, %v761_v23 }
 0x333   : > { %v762_v31 = vpop.trf.xlu0 }
 0x334   : > { %1278 = vmatprep.mubr.msk.f32.mxu0 %vm253_vm0, %v762_v31 }
 0x337   : > { %v763_v45 = vpop.trf.xlu0 }
 0x338   : > { %1279 = vmatmul.mubr.msk.f32.gmra.mrb[4].mxu0 %vm253_vm0, %v763_v45 }
 0x33b   : > { %v764_v43 = vpop.trf.xlu0 }
 0x33c   : > { %1281 = vmatprep.mubr.msk.f32.mxu0 %vm253_vm0, %v764_v43 }
 0x33f   : > { %v765_v24 = vpop.trf.xlu0 }
 0x340   : > { %1282 = vmatmul.mubr.msk.f32.gmra.mrb[6].mxu0 %vm253_vm0, %v765_v24 }
 0x343   : > { %v766_v25 = vpop.trf.xlu0 }
 0x344   : > { %1284 = vmatprep.mubr.msk.f32.mxu1 %vm253_vm0, %v766_v25 }
 0x347   : > { %v767_v26 = vpop.trf.xlu0 }
 0x348   : > { %1285 = vmatmul.mubr.msk.f32.vlgmr.msra.gmra.mrb[0].mxu1 %vm253_vm0, %v767_v26 }
 0x34b   : > { %v768_v27 = vpop.trf.xlu0 }
 0x34c   : > { %1287 = vmatprep.mubr.msk.f32.mxu1 %vm253_vm0, %v768_v27 }
 0x34f   : > { %v769_v28 = vpop.trf.xlu0 }
 0x350   : > { %1288 = vmatmul.mubr.msk.f32.gmra.mrb[2].mxu1 %vm253_vm0, %v769_v28 }
 0x353   : > { %v770_v29 = vpop.trf.xlu0 }
 0x354   : > { %1290 = vmatprep.mubr.msk.f32.mxu1 %vm253_vm0, %v770_v29 }
 0x357   : > { %v771_v34 = vpop.trf.xlu0 }
 0x358   : > { %1291 = vmatmul.mubr.msk.f32.gmra.mrb[4].mxu1 %vm253_vm0, %v771_v34 }
 0x35b   : > { %v772_v35 = vpop.trf.xlu0 }
 0x35c   : > { %1293 = vmatprep.mubr.msk.f32.mxu1 %vm253_vm0, %v772_v35 }
 0x35f   : > { %v773_v36 = vpop.trf.xlu0 }
 0x360   : > { %1294 = vmatmul.mubr.msk.f32.gmra.mrb[6].mxu1 %vm253_vm0, %v773_v36 }
 0x3fb   : > { %v1274_v39 = vpop.f32.mrb[0].mxu0 }
 0x3fc   : > { %v968_v40 = vadd.f32 %v1274_v39, %v727_v37  ;;  %v888_v41 = vpop.f32.mrb[1].mxu0 }
 0x3fd   : > { %v967_v46 = vadd.f32 %v888_v41, %v726_v38 }
 0x3fe   : > { %984 = vst [vmem:[#allocation2 + $0x8] sm:$0xff] %v968_v40 }
 0x3ff   : > { %983 = vst [vmem:[#allocation2] sm:$0xff] %v967_v46 }
 0x403   : > { %v1277_v49 = vpop.f32.mrb[2].mxu0 }
 0x404   : > { %v970_v50 = vadd.f32 %v1277_v49, %v729_v47  ;;  %v898_v51 = vpop.f32.mrb[3].mxu0 }
 0x405   : > { %v969_v52 = vadd.f32 %v898_v51, %v728_v48 }
 0x406   : > { %986 = vst [vmem:[#allocation2 + $0x18] sm:$0xff] %v970_v50 }
 0x407   : > { %985 = vst [vmem:[#allocation2 + $0x10] sm:$0xff] %v969_v52 }
 0x40b   : > { %v1280_v55 = vpop.f32.mrb[4].mxu0 }
 0x40c   : > { %v972_v56 = vadd.f32 %v1280_v55, %v731_v53  ;;  %v908_v57 = vpop.f32.mrb[5].mxu0 }
 0x40d   : > { %v971_v58 = vadd.f32 %v908_v57, %v730_v54 }
 0x40e   : > { %988 = vst [vmem:[#allocation2 + $0x28] sm:$0xff] %v972_v56 }
 0x40f   : > { %987 = vst [vmem:[#allocation2 + $0x20] sm:$0xff] %v971_v58 }
 0x413   : > { %v1283_v61 = vpop.f32.mrb[6].mxu0 }
 0x414   : > { %v974_v62 = vadd.f32 %v1283_v61, %v733_v59  ;;  %v918_v63 = vpop.f32.mrb[7].mxu0 }
 0x415   : > { %v973_v0 = vadd.f32 %v918_v63, %v732_v60 }
 0x416   : > { %990 = vst [vmem:[#allocation2 + $0x38] sm:$0xff] %v974_v62 }
 0x417   : > { %989 = vst [vmem:[#allocation2 + $0x30] sm:$0xff] %v973_v0 }
 0x41b   : > { %v1286_v3 = vpop.f32.mrb[0].mxu1 }
 0x41c   : > { %v976_v4 = vadd.f32 %v1286_v3, %v735_v1  ;;  %v928_v5 = vpop.f32.mrb[1].mxu1 }
 0x41d   : > { %v975_v6 = vadd.f32 %v928_v5, %v734_v2 }
 0x41e   : > { %992 = vst [vmem:[#allocation2 + $0x48] sm:$0xff] %v976_v4 }
 0x41f   : > { %991 = vst [vmem:[#allocation2 + $0x40] sm:$0xff] %v975_v6 }
 0x423   : > { %v1289_v9 = vpop.f32.mrb[2].mxu1 }
 0x424   : > { %v978_v10 = vadd.f32 %v1289_v9, %v737_v7  ;;  %v938_v11 = vpop.f32.mrb[3].mxu1 }
 0x425   : > { %v977_v12 = vadd.f32 %v938_v11, %v736_v8 }
 0x426   : > { %994 = vst [vmem:[#allocation2 + $0x58] sm:$0xff] %v978_v10 }
 0x427   : > { %993 = vst [vmem:[#allocation2 + $0x50] sm:$0xff] %v977_v12 }
 0x42b   : > { %v1292_v32 = vpop.f32.mrb[4].mxu1 }
 0x42c   : > { %v980_v15 = vadd.f32 %v1292_v32, %v739_v13  ;;  %v948_v30 = vpop.f32.mrb[5].mxu1 }
 0x42d   : > { %v979_v16 = vadd.f32 %v948_v30, %v738_v14 }
 0x42e   : > { %996 = vst [vmem:[#allocation2 + $0x68] sm:$0xff] %v980_v15 }
 0x42f   : > { %995 = vst [vmem:[#allocation2 + $0x60] sm:$0xff] %v979_v16 }
 0x433   : > { %v1295_v18 = vpop.f32.mrb[6].mxu1 }
 0x434   : > { %v982_v19 = vadd.f32 %v1295_v18, %v741_v17  ;;  %v958_v42 = vpop.f32.mrb[7].mxu1 }
 0x435   : > { %v981_v20 = vadd.f32 %v958_v42, %v740_v44 }
 0x436   : > { %998 = vst [vmem:[#allocation2 + $0x78] sm:$0xff] %v982_v19 }
 0x437   : > { %997 = vst [vmem:[#allocation2 + $0x70] sm:$0xff] %v981_v20 }
 0x438 PF: > { %p1674_p8 = scmp.eq.s32.totalorder %s1061_s15, 3  ;;  %s1467_s20 = smov [#allocation2]  }
 0x439   : > { %s1008_s21 = sshll.u32 %s1467_s20, 4  ;;  %s1009_s21 = int_to_ptr.vmem [resolvable:$true] %s1008_s21 }
 0x43a   : > { %s1412_s22 = scalar_lea.vmem %s1009_s21, 2048  ;;  %p1419_p12 = scmp.lt.s32.totalorder %s1009_s21, %s1009_s21 }
 0x43b   : > { %p1413_p9 = scmp.ne.s32.totalorder %s1009_s21, %s1412_s22  ;;  %p1420_p13 = scmp.lt.s32.totalorder %s1412_s22, %s1412_s22 }
 0x43d   : > { %p1414_p10 = pnand %p1413_p9, %p1674_p8  ;;  %p1421_p0 = por %p1420_p13, %p1419_p12 }
 0x43f   : > { %p1415_p11 = pneg %p1414_p10 }
 0x441   : > { %p1422_p1 = pnand %p1421_p0, %p1415_p11 }
 0x443   : > { %1425 = shalt.err (!%p1422_p1)
}
 0x444   : > { %s1426_s15 = scalar_lea.hbm %s1712_s3, 2048 }
 0x445   : > { %p1427_p2 = scmp.ne.s32.totalorder %s1712_s3, %s1426_s15  ;;  %p1432_p5 = scmp.lt.u32.totalorder %s1426_s15, %s1712_s3 }
 0x447   : > { %p1428_p3 = pnand %p1427_p2, %p1674_p8 }
 0x449   : > { %p1429_p4 = pneg %p1428_p3 }
 0x44b   : > { %p1434_p6 = pnand %p1432_p5, %p1429_p4 }
 0x44d   : > { %1437 = shalt.err (!%p1434_p6)
}
 0x44e   : > { %s1468_s29 = smov 128   ;;  %s1469_s30 = smov 8  }
 0x44f   : > { %1377 = dma.vmem_to_hbm [thread:$0]  (%p1674_p8), %s1009_s21, 2048, %s1712_s3, [#allocation3], %s1468_s29, %s1468_s29, %s1469_s30  }
 0x450   : > { %1451 = dma.done.wait (%p1674_p8), [#allocation3], 2048  }
 0x451   : > { %1453 = vsyncadd (%p1674_p8), [#allocation3], 4294965248 }
 0x452 PF: > { %s14_s14 = sadd.s32 1, %s1464_s14   ;;  %s1716_s12 = smov %s1460_s13 }
 0x453   : > { %p11_p7 = scmp.ge.s32.totalorder %s14_s14, 6   ;;  %s1717_s13 = smov %s1719_s16 }
 0x455   :  { %13 = sbr.rel (!%p11_p7) target bundleno = 2 (0x2), region = 72 }
 0x45c   :  { %1024 = vsyncpa [#allocation3], 1 }
 0x45d   :  { %1026 = vsyncpa [#allocation3 + $0x1], 1 }

</bundles_post_ra>
